<compile_context>
chip_gen: v7x
topology: tpu7x:2x2x1
jax: 0.10.0
libtpu: 0.0.40
codegen_flags: <defaults>
</compile_context>

<pallas_src>
import jax
import jax.numpy as jnp
from jax import lax
from jax.experimental import pallas as pl
from jax.experimental.pallas import tpu as pltpu

_LANES = 128
_SUBLANES = 8
_CHUNK_ROWS = 1024          # 512 KiB f32 per operand per streamed chunk
_MIN_KERNEL_ELEMS = 32 * 1024  # below this, plain JAX is faster than dispatch


def _mlce_kernel(inp_ref, tgt_ref, partial_ref):
    tile_rows = inp_ref.shape[0]
    chunk = min(_CHUNK_ROWS, tile_rows)
    n_chunks = tile_rows // chunk      # exact by construction in the wrapper

    def reduce_chunk(x, t):
        p = jnp.log(x) * t             # EUP log + VPU mul, per-chunk only
        # (chunk,128) -> (8,128): layout-preserving reshape + pure vreg adds.
        return jnp.sum(p.reshape(chunk // _SUBLANES, _SUBLANES, _LANES), axis=0)

    if n_chunks == 1:
        partial_ref[...] = reduce_chunk(inp_ref[...].astype(jnp.float32),
                                        tgt_ref[...].astype(jnp.float32))
    else:
        def body(c, acc):
            start = pl.multiple_of(c * chunk, chunk)
            x = inp_ref[pl.ds(start, chunk), :].astype(jnp.float32)
            t = tgt_ref[pl.ds(start, chunk), :].astype(jnp.float32)
            return acc + reduce_chunk(x, t)

        acc0 = jnp.zeros((_SUBLANES, _LANES), jnp.float32)
        partial_ref[...] = lax.fori_loop(0, n_chunks, body, acc0, unroll=False)


def _round_down(x, m):
    return (x // m) * m


def _jax_mlce_sum(inp_flat, tgt_flat):
    x = inp_flat.astype(jnp.float32)
    t = tgt_flat.astype(jnp.float32)
    return jnp.dot(jnp.log(x), t)


def multi_label_cross_entropy(inp, tgt, *, max_tile_rows=16384):
    """Computes -dot(log(inp).ravel(), tgt.ravel()) / inp.shape[0] on TPU."""
    assert inp.shape == tgt.shape
    n_rows = inp.shape[0]

    total = 1
    for d in inp.shape:
        total *= d

    inp_flat = inp.reshape(-1)
    tgt_flat = tgt.reshape(-1)

    # Small-problem fast path: the fused XLA expression beats kernel dispatch.
    if total < _MIN_KERNEL_ELEMS:
        return -_jax_mlce_sum(inp_flat, tgt_flat) / jnp.float32(n_rows)

    # Lane-dense layout: view the leading "bulk" of the flattened arrays as
    # (rows, 128).  No padding copy -- the sub-tile tail is handled in JAX.
    rows = total // _LANES
    tile_rows = min(max_tile_rows, rows)
    if tile_rows >= _CHUNK_ROWS:
        tile_rows = _round_down(tile_rows, _CHUNK_ROWS)
    else:
        tile_rows = _round_down(tile_rows, _SUBLANES)
    num_blocks = rows // tile_rows
    bulk_rows = num_blocks * tile_rows
    bulk_len = bulk_rows * _LANES

    inp2d = inp_flat[:bulk_len].reshape(bulk_rows, _LANES)
    tgt2d = tgt_flat[:bulk_len].reshape(bulk_rows, _LANES)

    partials = pl.pallas_call(
        _mlce_kernel,
        out_shape=jax.ShapeDtypeStruct((num_blocks * _SUBLANES, _LANES),
                                       jnp.float32),
        grid=(num_blocks,),
        in_specs=[
            pl.BlockSpec((tile_rows, _LANES), lambda i: (i, 0)),
            pl.BlockSpec((tile_rows, _LANES), lambda i: (i, 0)),
        ],
        out_specs=pl.BlockSpec((_SUBLANES, _LANES), lambda i: (i, 0)),
        compiler_params=pltpu.CompilerParams(
            # Each step writes its own partial block -> fully parallel grid
            # (shards across both TensorCores on v7x; no-op on v5e/v6e).
            # Profile-verify on v7x that both TCs are active; if not, add an
            # explicit leading core axis.
            dimension_semantics=("parallel",),
            # 2 inputs x 2 pipeline buffers x 8 MiB (f32 @ 16384 rows) = 32 MiB
            # plus small per-chunk temps: fits v7x's 64 MiB, trivial elsewhere.
            vmem_limit_bytes=48 * 1024 * 1024,
        ),
        cost_estimate=pl.CostEstimate(
            flops=2 * bulk_len,
            transcendentals=bulk_len,
            bytes_accessed=(bulk_len * (inp.dtype.itemsize + tgt.dtype.itemsize)
                            + num_blocks * _SUBLANES * _LANES * 4),
        ),
    )(inp2d, tgt2d)

    loss_sum = jnp.sum(partials)

    # Sub-tile tail (< tile_rows*128 + 128 elements): tiny plain-JAX dot,
    # avoids any padding copy of the big inputs.
    if bulk_len < total:
        loss_sum = loss_sum + _jax_mlce_sum(inp_flat[bulk_len:],
                                            tgt_flat[bulk_len:])

    return -loss_sum / jnp.float32(n_rows)


if __name__ == "__main__":
    key = jax.random.PRNGKey(0)

    def make_inputs(k, batch, classes, dtype=jnp.float32):
        k_in, k_tgt = jax.random.split(k)
        logits = jax.random.normal(k_in, (batch, classes), dtype=jnp.float32)
        inp = jax.nn.softmax(logits, axis=-1).astype(dtype)  # >0 -> log is finite
        tgt = jax.random.uniform(k_tgt, (batch, classes),
                                 dtype=jnp.float32).astype(dtype)
        return inp, tgt

    def reference(inp, tgt):
        x = inp.reshape(-1).astype(jnp.float32)
        t = tgt.reshape(-1).astype(jnp.float32)
        return -jnp.dot(jnp.log(x), t) / jnp.float32(inp.shape[0])

    k1, k2, k3 = jax.random.split(key, 3)

    # 1) Small shape consistent with the module (pure-JAX fast path).
    inp, tgt = make_inputs(k1, 16, 256)
    out_small = jax.block_until_ready(multi_label_cross_entropy(inp, tgt))
    assert jnp.allclose(out_small, reference(inp, tgt), rtol=1e-5, atol=1e-5), (
        out_small, reference(inp, tgt))

    # 2) Kernel path: single block, single chunk, plus a ragged 96-element tail.
    inp, tgt = make_inputs(k2, 32, 1027)
    out_one = jax.block_until_ready(multi_label_cross_entropy(inp, tgt))
    assert jnp.allclose(out_one, reference(inp, tgt), rtol=1e-4, atol=1e-4), (
        out_one, reference(inp, tgt))

    # 3) Kernel path: bf16 inputs, multi-block grid (2 blocks), chunked
    #    fori_loop reduce (2 chunks/block), plus a tail; small max_tile_rows
    #    keeps the test shapes tiny while exercising every code path.
    inp, tgt = make_inputs(k3, 16, 33000, dtype=jnp.bfloat16)
    out_multi = jax.block_until_ready(
        multi_label_cross_entropy(inp, tgt, max_tile_rows=2048))
    ref_multi = reference(inp, tgt)
    assert jnp.allclose(out_multi, ref_multi, rtol=1e-3, atol=1e-3), (
        out_multi, ref_multi)

    print("KERNEL_OK")
</pallas_src>

<mosaic_0001>
module attributes {stable_mosaic.version = 11 : i64} {
  func.func @_mlce_kernel(%arg0: i32, %arg1: memref<256x128xf32, #tpu.memory_space<vmem>>, %arg2: memref<256x128xf32, #tpu.memory_space<vmem>>, %arg3: memref<8x128xf32, #tpu.memory_space<vmem>>) attributes {dimension_semantics = [#tpu.dimension_semantics<parallel>], iteration_bounds = array<i64: 1>, scalar_prefetch = 0 : i64, scratch_operands = 0 : i64, tpu.core_type = #tpu.core_type<tc>, window_params = [{transform_indices = @transform_0, window_bounds = array<i64: 256, 128>}, {transform_indices = @transform_1, window_bounds = array<i64: 256, 128>}, {transform_indices = @transform_2, window_bounds = array<i64: 8, 128>}]} {
    %c0 = arith.constant 0 : index
    %c0_0 = arith.constant 0 : index
    %0 = vector.load %arg1[%c0, %c0_0] : memref<256x128xf32, #tpu.memory_space<vmem>>, vector<256x128xf32>
    %c0_1 = arith.constant 0 : index
    %c0_2 = arith.constant 0 : index
    %1 = vector.load %arg2[%c0_1, %c0_2] : memref<256x128xf32, #tpu.memory_space<vmem>>, vector<256x128xf32>
    %2 = math.log %0 : vector<256x128xf32>
    %3 = arith.mulf %2, %1 : vector<256x128xf32>
    %4 = vector.shape_cast %3 : vector<256x128xf32> to vector<32x8x128xf32>
    %cst = arith.constant dense<0.000000e+00> : vector<8x128xf32>
    %5 = vector.multi_reduction <add>, %4, %cst [0] : vector<32x8x128xf32> to vector<8x128xf32>
    %c0_3 = arith.constant 0 : index
    %c0_4 = arith.constant 0 : index
    %6 = vector.load %arg3[%c0_3, %c0_4] : memref<8x128xf32, #tpu.memory_space<vmem>>, vector<8x128xf32>
    tpu.vector_store %arg3[%c0_3, %c0_4], %5 {strides = array<i32>} : memref<8x128xf32, #tpu.memory_space<vmem>>, vector<8x128xf32>,
    return
  }
  func.func @transform_0(%arg0: i32) -> (i32, i32) {
    %c0_i32 = arith.constant 0 : i32
    %c0_i32_0 = arith.constant 0 : i32
    return %arg0, %c0_i32 : i32, i32
  }
  func.func @transform_1(%arg0: i32) -> (i32, i32) {
    %c0_i32 = arith.constant 0 : i32
    %c0_i32_0 = arith.constant 0 : i32
    return %arg0, %c0_i32 : i32, i32
  }
  func.func @transform_2(%arg0: i32) -> (i32, i32) {
    %c0_i32 = arith.constant 0 : i32
    %c0_i32_0 = arith.constant 0 : i32
    return %arg0, %c0_i32 : i32, i32
  }
}

</mosaic_0001>

<bundles_post_ra>
// kernel: tpu_custom_call.1
= control target key start
LH: loop header
LB: loop body
LE: loop exit
PB: predicated region body
PF: predicated region fallthrough
CT: control target
= control target key end

     0   :  { %7 = vsyncpa [#allocation3], 0  ;;  %s445_s0 = inlined_call_operand.hbm [shape: f32[256,128], index: 0, kind: input, shape index: {}]   ;;  %s446_s1 = inlined_call_operand.hbm [shape: f32[256,128], index: 1, kind: input, shape index: {}]   ;;  %s447_s2 = inlined_call_operand.hbm [shape: f32[8,128], index: 2, kind: output, shape index: {}]  }
   0x1   :  { %8 = vsyncpa [#allocation6], 0 }
   0x2   :  { %9 = vsyncpa [#allocation4], 0  ;;  %s389_s9 = smov [#allocation2]   ;;  %s317_s13 = scalar_lea.hbm %s445_s0, 4096 }
   0x3   :  { %s15_s10 = sshll.u32 %s389_s9, 4  ;;  %p318_p0 = scmp.ne.s32.totalorder %s445_s0, %s317_s13  ;;  %s16_s10 = int_to_ptr.vmem [resolvable:$true] %s15_s10 }
   0x4   :  { %p321_p1 = scmp.lt.u32.totalorder %s317_s13, %s445_s0 }
   0x6   :  { %p323_p2 = pnand %p321_p1, %p318_p0 }
   0x8   :  { %326 = shalt.err (!%p323_p2)
}
   0x9   :  { %s327_s18 = scalar_lea.vmem %s16_s10, 4096  ;;  %p332_p4 = scmp.lt.s32.totalorder %s16_s10, %s16_s10 }
   0xa   :  { %p328_p3 = scmp.ne.s32.totalorder %s16_s10, %s327_s18  ;;  %p333_p5 = scmp.lt.s32.totalorder %s327_s18, %s327_s18 }
   0xc   :  { %p334_p6 = por %p333_p5, %p332_p4 }
   0xe   :  { %p335_p7 = pnand %p334_p6, %p328_p3 }
  0x10   :  { %338 = shalt.err (!%p335_p7)
}
  0x11   :  { %s390_s19 = smov 128   ;;  %s391_s20 = smov 8  }
  0x12   :  { %21 = dma.hbm_to_vmem [thread:$0]  %s445_s0, 4096, %s16_s10, [#allocation3], %s390_s19, %s390_s19, %s391_s20  }
  0x13   :  { %s392_s23 = smov [#allocation5]   ;;  %s339_s27 = scalar_lea.hbm %s446_s1, 4096 }
  0x14   :  { %s27_s24 = sshll.u32 %s392_s23, 4  ;;  %p340_p8 = scmp.ne.s32.totalorder %s446_s1, %s339_s27  ;;  %s28_s24 = int_to_ptr.vmem [resolvable:$true] %s27_s24 }
  0x15   :  { %p343_p9 = scmp.lt.u32.totalorder %s339_s27, %s446_s1 }
  0x17   :  { %p345_p10 = pnand %p343_p9, %p340_p8 }
  0x19   :  { %348 = shalt.err (!%p345_p10)
}
  0x1a   :  { %s349_s4 = scalar_lea.vmem %s28_s24, 4096  ;;  %p354_p12 = scmp.lt.s32.totalorder %s28_s24, %s28_s24 }
  0x1b   :  { %p350_p11 = scmp.ne.s32.totalorder %s28_s24, %s349_s4  ;;  %p355_p13 = scmp.lt.s32.totalorder %s349_s4, %s349_s4 }
  0x1d   :  { %p356_p0 = por %p355_p13, %p354_p12 }
  0x1f   :  { %p357_p1 = pnand %p356_p0, %p350_p11 }
  0x21   :  { %360 = shalt.err (!%p357_p1)
}
  0x22   :  { %33 = dma.hbm_to_vmem [thread:$0]  %s446_s1, 4096, %s28_s24, [#allocation6], %s390_s19, %s390_s19, %s391_s20  }
  0x23   :  { %383 = dma.done.wait [#allocation3], 4096  }
  0x24   :  { %384 = vsyncadd [#allocation3], 4294963200 }
  0x25   :  { %385 = dma.done.wait [#allocation6], 4096  }
  0x26   :  { %386 = vsyncadd [#allocation6], 4294963200  ;;  %v40_v0 = vld [vmem:[#allocation2] sm:$0xff]  ;;  %v41_v1 = vld [vmem:[#allocation2 + $0x8] sm:$0xff]  ;;  %s393_s1 = smov [#allocation7]  }
  0x27   :  { %v42_v2 = vld [vmem:[#allocation2 + $0x10] sm:$0xff]  ;;  %v43_v3 = vld [vmem:[#allocation2 + $0x18] sm:$0xff]  ;;  %253 = vlog2.f32 %v40_v0  ;;  %v44_v4 = vld [vmem:[#allocation2 + $0x20] sm:$0xff]  ;;  %s238_s6 = sshll.u32 %s393_s1, 4  ;;  %s239_s6 = int_to_ptr.vmem [resolvable:$true] %s238_s6 }
  0x28   :  { %255 = vlog2.f32 %v41_v1  ;;  %v45_v5 = vld [vmem:[#allocation2 + $0x28] sm:$0xff]  ;;  %v46_v6 = vld [vmem:[#allocation2 + $0x30] sm:$0xff]  ;;  %v47_v7 = vld [vmem:[#allocation2 + $0x38] sm:$0xff]  ;;  %s361_s7 = scalar_lea.vmem %s239_s6, 128  ;;  %p366_p3 = scmp.lt.s32.totalorder %s239_s6, %s239_s6 }
  0x29   :  { %257 = vlog2.f32 %v42_v2  ;;  %v48_v8 = vld [vmem:[#allocation2 + $0x40] sm:$0xff]  ;;  %v49_v9 = vld [vmem:[#allocation2 + $0x48] sm:$0xff]  ;;  %v50_v11 = vld [vmem:[#allocation2 + $0x50] sm:$0xff]  ;;  %p362_p2 = scmp.ne.s32.totalorder %s239_s6, %s361_s7  ;;  %p367_p4 = scmp.lt.s32.totalorder %s361_s7, %s361_s7 }
  0x2a   :  { %259 = vlog2.f32 %v43_v3  ;;  %v72_v12 = vld [vmem:[#allocation5] sm:$0xff]  ;;  %v73_v14 = vld [vmem:[#allocation5 + $0x8] sm:$0xff]  ;;  %v51_v17 = vld [vmem:[#allocation2 + $0x58] sm:$0xff] }
  0x2b   :  { %261 = vlog2.f32 %v44_v4  ;;  %v74_v18 = vld [vmem:[#allocation5 + $0x10] sm:$0xff]  ;;  %v75_v21 = vld [vmem:[#allocation5 + $0x18] sm:$0xff]  ;;  %v52_v25 = vld [vmem:[#allocation2 + $0x60] sm:$0xff]  ;;  %p368_p5 = por %p367_p4, %p366_p3 }
  0x2c   :  { %263 = vlog2.f32 %v45_v5  ;;  %v76_v29 = vld [vmem:[#allocation5 + $0x20] sm:$0xff]  ;;  %v53_v33 = vld [vmem:[#allocation2 + $0x68] sm:$0xff]  ;;  %v54_v39 = vld [vmem:[#allocation2 + $0x70] sm:$0xff] }
  0x2d   :  { %265 = vlog2.f32 %v46_v6  ;;  %v77_v38 = vld [vmem:[#allocation5 + $0x28] sm:$0xff]  ;;  %v78_v44 = vld [vmem:[#allocation5 + $0x30] sm:$0xff]  ;;  %v55_v45 = vld [vmem:[#allocation2 + $0x78] sm:$0xff]  ;;  %p369_p6 = pnand %p368_p5, %p362_p2 }
  0x2e   :  { %267 = vlog2.f32 %v47_v7  ;;  %v79_v50 = vld [vmem:[#allocation5 + $0x38] sm:$0xff]  ;;  %v56_v51 = vld [vmem:[#allocation2 + $0x80] sm:$0xff]  ;;  %v57_v57 = vld [vmem:[#allocation2 + $0x88] sm:$0xff] }
  0x2f   :  { %269 = vlog2.f32 %v48_v8  ;;  %v80_v56 = vld [vmem:[#allocation5 + $0x40] sm:$0xff]  ;;  %v81_v62 = vld [vmem:[#allocation5 + $0x48] sm:$0xff]  ;;  %v58_v63 = vld [vmem:[#allocation2 + $0x90] sm:$0xff] }
  0x30   :  { %271 = vlog2.f32 %v49_v9  ;;  %v82_v4 = vld [vmem:[#allocation5 + $0x50] sm:$0xff]  ;;  %v59_v5 = vld [vmem:[#allocation2 + $0x98] sm:$0xff] }
  0x31   :  { %v254_v10 = vpop.eup %253  ;;  %273 = vlog2.f32 %v50_v11  ;;  %v60_v11 = vld [vmem:[#allocation2 + $0xa0] sm:$0xff] }
  0x32   :  { %v256_v13 = vpop.eup %255  ;;  %v105_v15 = vmul.f32 0.6931472, %v254_v10  ;;  %275 = vlog2.f32 %v51_v17  ;;  %v83_v10 = vld [vmem:[#allocation5 + $0x58] sm:$0xff]  ;;  %v61_v17 = vld [vmem:[#allocation2 + $0xa8] sm:$0xff] }
  0x33   :  { %v258_v16 = vpop.eup %257  ;;  %v107_v19 = vmul.f32 0.6931472, %v256_v13  ;;  %277 = vlog2.f32 %v52_v25 }
  0x34   :  { %v260_v20 = vpop.eup %259  ;;  %v109_v22 = vmul.f32 0.6931472, %v258_v16  ;;  %v168_v23 = vmul.f32 %v105_v15, %v72_v12  ;;  %279 = vlog2.f32 %v53_v33  ;;  %v84_v16 = vld [vmem:[#allocation5 + $0x60] sm:$0xff] }
  0x35   :  { %v262_v24 = vpop.eup %261  ;;  %v111_v26 = vmul.f32 0.6931472, %v260_v20  ;;  %v169_v27 = vmul.f32 %v107_v19, %v73_v14  ;;  %281 = vlog2.f32 %v54_v39 }
  0x36   :  { %v264_v28 = vpop.eup %263  ;;  %v113_v30 = vmul.f32 0.6931472, %v262_v24  ;;  %v170_v31 = vmul.f32 %v109_v22, %v74_v18  ;;  %283 = vlog2.f32 %v55_v45  ;;  %v85_v22 = vld [vmem:[#allocation5 + $0x68] sm:$0xff] }
  0x37   :  { %v266_v32 = vpop.eup %265  ;;  %v115_v34 = vmul.f32 0.6931472, %v264_v28  ;;  %v171_v35 = vmul.f32 %v111_v26, %v75_v21  ;;  %v200_v36 = vadd.f32 %v169_v27, %v168_v23  ;;  %285 = vlog2.f32 %v56_v51  ;;  %v62_v23 = vld [vmem:[#allocation2 + $0xb0] sm:$0xff] }
  0x38   :  { %v268_v37 = vpop.eup %267  ;;  %v117_v40 = vmul.f32 0.6931472, %v266_v32  ;;  %v172_v41 = vmul.f32 %v113_v30, %v76_v29  ;;  %287 = vlog2.f32 %v57_v57  ;;  %v86_v28 = vld [vmem:[#allocation5 + $0x70] sm:$0xff]  ;;  %v63_v29 = vld [vmem:[#allocation2 + $0xb8] sm:$0xff] }
  0x39   :  { %v201_v42 = vadd.f32 %v200_v36, %v170_v31  ;;  %v270_v43 = vpop.eup %269  ;;  %v119_v46 = vmul.f32 0.6931472, %v268_v37  ;;  %v173_v47 = vmul.f32 %v115_v34, %v77_v38  ;;  %289 = vlog2.f32 %v58_v63  ;;  %v87_v34 = vld [vmem:[#allocation5 + $0x78] sm:$0xff] }
  0x3a   :  { %v272_v49 = vpop.eup %271  ;;  %v121_v52 = vmul.f32 0.6931472, %v270_v43  ;;  %v174_v53 = vmul.f32 %v117_v40, %v78_v44  ;;  %291 = vlog2.f32 %v59_v5  ;;  %v88_v40 = vld [vmem:[#allocation5 + $0x80] sm:$0xff] }
  0x3b   :  { %v202_v48 = vadd.f32 %v201_v42, %v171_v35  ;;  %v274_v55 = vpop.eup %273  ;;  %v123_v58 = vmul.f32 0.6931472, %v272_v49  ;;  %v175_v59 = vmul.f32 %v119_v46, %v79_v50  ;;  %293 = vlog2.f32 %v60_v11  ;;  %v64_v35 = vld [vmem:[#allocation2 + $0xc0] sm:$0xff]  ;;  %v89_v46 = vld [vmem:[#allocation5 + $0x88] sm:$0xff] }
  0x3c   :  { %v276_v61 = vpop.eup %275  ;;  %v125_v0 = vmul.f32 0.6931472, %v274_v55  ;;  %v176_v1 = vmul.f32 %v121_v52, %v80_v56  ;;  %295 = vlog2.f32 %v61_v17  ;;  %v90_v52 = vld [vmem:[#allocation5 + $0x90] sm:$0xff] }
  0x3d   :  { %v203_v54 = vadd.f32 %v202_v48, %v172_v41  ;;  %v278_v3 = vpop.eup %277  ;;  %v127_v6 = vmul.f32 0.6931472, %v276_v61  ;;  %v177_v7 = vmul.f32 %v123_v58, %v81_v62  ;;  %297 = vlog2.f32 %v62_v23  ;;  %v65_v41 = vld [vmem:[#allocation2 + $0xc8] sm:$0xff]  ;;  %v91_v58 = vld [vmem:[#allocation5 + $0x98] sm:$0xff]  ;;  %v96_v23 = vld [vmem:[#allocation5 + $0xc0] sm:$0xff] }
  0x3e   :  { %v280_v9 = vpop.eup %279  ;;  %v129_v12 = vmul.f32 0.6931472, %v278_v3  ;;  %v178_v13 = vmul.f32 %v125_v0, %v82_v4  ;;  %299 = vlog2.f32 %v63_v29  ;;  %v92_v0 = vld [vmem:[#allocation5 + $0xa0] sm:$0xff] }
  0x3f   :  { %v204_v60 = vadd.f32 %v203_v54, %v173_v47  ;;  %v282_v15 = vpop.eup %281  ;;  %v131_v18 = vmul.f32 0.6931472, %v280_v9  ;;  %v179_v19 = vmul.f32 %v127_v6, %v83_v10  ;;  %301 = vlog2.f32 %v64_v35  ;;  %v66_v47 = vld [vmem:[#allocation2 + $0xd0] sm:$0xff]  ;;  %v93_v6 = vld [vmem:[#allocation5 + $0xa8] sm:$0xff] }
  0x40   :  { %v284_v21 = vpop.eup %283  ;;  %v133_v24 = vmul.f32 0.6931472, %v282_v15  ;;  %v180_v25 = vmul.f32 %v129_v12, %v84_v16  ;;  %303 = vlog2.f32 %v65_v41  ;;  %v94_v12 = vld [vmem:[#allocation5 + $0xb0] sm:$0xff] }
  0x41   :  { %v205_v2 = vadd.f32 %v204_v60, %v174_v53  ;;  %v286_v27 = vpop.eup %285  ;;  %v135_v30 = vmul.f32 0.6931472, %v284_v21  ;;  %v181_v31 = vmul.f32 %v131_v18, %v85_v22  ;;  %v67_v53 = vld [vmem:[#allocation2 + $0xd8] sm:$0xff]  ;;  %305 = vlog2.f32 %v66_v47 }
  0x42   :  { %v288_v33 = vpop.eup %287  ;;  %v137_v36 = vmul.f32 0.6931472, %v286_v27  ;;  %v182_v37 = vmul.f32 %v133_v24, %v86_v28  ;;  %307 = vlog2.f32 %v67_v53  ;;  %v95_v18 = vld [vmem:[#allocation5 + $0xb8] sm:$0xff]  ;;  %v97_v28 = vld [vmem:[#allocation5 + $0xc8] sm:$0xff] }
  0x43   :  { %v206_v8 = vadd.f32 %v205_v2, %v175_v59  ;;  %v290_v39 = vpop.eup %289  ;;  %v139_v42 = vmul.f32 0.6931472, %v288_v33  ;;  %v183_v43 = vmul.f32 %v135_v30, %v87_v34  ;;  %v68_v59 = vld [vmem:[#allocation2 + $0xe0] sm:$0xff]  ;;  %v98_v33 = vld [vmem:[#allocation5 + $0xd0] sm:$0xff] }
  0x44   :  { %v292_v45 = vpop.eup %291  ;;  %v141_v48 = vmul.f32 0.6931472, %v290_v39  ;;  %v184_v49 = vmul.f32 %v137_v36, %v88_v40  ;;  %309 = vlog2.f32 %v68_v59 }
  0x45   :  { %v207_v14 = vadd.f32 %v206_v8, %v176_v1  ;;  %v294_v51 = vpop.eup %293  ;;  %v143_v54 = vmul.f32 0.6931472, %v292_v45  ;;  %v185_v55 = vmul.f32 %v139_v42, %v89_v46  ;;  %v69_v1 = vld [vmem:[#allocation2 + $0xe8] sm:$0xff] }
  0x46   :  { %v296_v57 = vpop.eup %295  ;;  %v145_v60 = vmul.f32 0.6931472, %v294_v51  ;;  %v186_v61 = vmul.f32 %v141_v48, %v90_v52  ;;  %311 = vlog2.f32 %v69_v1  ;;  %v101_v48 = vld [vmem:[#allocation5 + $0xe8] sm:$0xff]  ;;  %v102_v52 = vld [vmem:[#allocation5 + $0xf0] sm:$0xff] }
  0x47   :  { %v208_v20 = vadd.f32 %v207_v14, %v177_v7  ;;  %v298_v63 = vpop.eup %297  ;;  %v147_v2 = vmul.f32 0.6931472, %v296_v57  ;;  %v187_v3 = vmul.f32 %v143_v54, %v91_v58  ;;  %v70_v7 = vld [vmem:[#allocation2 + $0xf0] sm:$0xff] }
  0x48   :  { %v300_v5 = vpop.eup %299  ;;  %v149_v8 = vmul.f32 0.6931472, %v298_v63  ;;  %v188_v9 = vmul.f32 %v145_v60, %v92_v0  ;;  %313 = vlog2.f32 %v70_v7 }
  0x49   :  { %v209_v26 = vadd.f32 %v208_v20, %v178_v13  ;;  %v302_v11 = vpop.eup %301  ;;  %v71_v13 = vld [vmem:[#allocation2 + $0xf8] sm:$0xff]  ;;  %v151_v14 = vmul.f32 0.6931472, %v300_v5  ;;  %v189_v15 = vmul.f32 %v147_v2, %v93_v6 }
  0x4a   :  { %v304_v17 = vpop.eup %303  ;;  %v190_v20 = vmul.f32 %v149_v8, %v94_v12  ;;  %315 = vlog2.f32 %v71_v13 }
  0x4b   :  { %v210_v32 = vadd.f32 %v209_v26, %v179_v19  ;;  %v153_v19 = vmul.f32 0.6931472, %v302_v11  ;;  %v306_v22 = vpop.eup %305  ;;  %v155_v24 = vmul.f32 0.6931472, %v304_v17 }
  0x4c   :  { %v308_v27 = vpop.eup %307  ;;  %v157_v29 = vmul.f32 0.6931472, %v306_v22 }
  0x4d   :  { %v211_v38 = vadd.f32 %v210_v32, %v180_v25  ;;  %v191_v25 = vmul.f32 %v151_v14, %v95_v18  ;;  %v192_v30 = vmul.f32 %v153_v19, %v96_v23  ;;  %v159_v34 = vmul.f32 0.6931472, %v308_v27 }
  0x4e   :  { %v310_v32 = vpop.eup %309  ;;  %v193_v35 = vmul.f32 %v155_v24, %v97_v28  ;;  %v194_v40 = vmul.f32 %v157_v29, %v98_v33 }
  0x4f   :  { %v212_v44 = vadd.f32 %v211_v38, %v181_v31  ;;  %v99_v38 = vld [vmem:[#allocation5 + $0xd8] sm:$0xff]  ;;  %v161_v39 = vmul.f32 0.6931472, %v310_v32 }
  0x50   :  { %v195_v45 = vmul.f32 %v159_v34, %v99_v38 }
  0x51   :  { %v213_v50 = vadd.f32 %v212_v44, %v182_v37  ;;  %v312_v37 = vpop.eup %311 }
  0x52   :  { %v314_v42 = vpop.eup %313  ;;  %v163_v44 = vmul.f32 0.6931472, %v312_v37 }
  0x53   :  { %v214_v56 = vadd.f32 %v213_v50, %v183_v43  ;;  %v100_v43 = vld [vmem:[#allocation5 + $0xe0] sm:$0xff] }
  0x54   :  { %v316_v47 = vpop.eup %315  ;;  %v196_v50 = vmul.f32 %v161_v39, %v100_v43  ;;  %v197_v54 = vmul.f32 %v163_v44, %v101_v48 }
  0x55   :  { %v215_v62 = vadd.f32 %v214_v56, %v184_v49  ;;  %v165_v49 = vmul.f32 0.6931472, %v314_v42  ;;  %v167_v53 = vmul.f32 0.6931472, %v316_v47  ;;  %v103_v56 = vld [vmem:[#allocation5 + $0xf8] sm:$0xff] }
  0x57   :  { %v216_v4 = vadd.f32 %v215_v62, %v185_v55  ;;  %v198_v57 = vmul.f32 %v165_v49, %v102_v52  ;;  %v199_v59 = vmul.f32 %v167_v53, %v103_v56 }
  0x59   :  { %v217_v10 = vadd.f32 %v216_v4, %v186_v61 }
  0x5b   :  { %v218_v16 = vadd.f32 %v217_v10, %v187_v3 }
  0x5d   :  { %v219_v21 = vadd.f32 %v218_v16, %v188_v9 }
  0x5f   :  { %v220_v26 = vadd.f32 %v219_v21, %v189_v15 }
  0x61   :  { %v221_v31 = vadd.f32 %v220_v26, %v190_v20 }
  0x63   :  { %v222_v36 = vadd.f32 %v221_v31, %v191_v25 }
  0x65   :  { %v223_v41 = vadd.f32 %v222_v36, %v192_v30 }
  0x67   :  { %v224_v46 = vadd.f32 %v223_v41, %v193_v35 }
  0x69   :  { %v225_v51 = vadd.f32 %v224_v46, %v194_v40 }
  0x6b   :  { %v226_v55 = vadd.f32 %v225_v51, %v195_v45 }
  0x6d   :  { %v227_v58 = vadd.f32 %v226_v55, %v196_v50 }
  0x6f   :  { %v228_v60 = vadd.f32 %v227_v58, %v197_v54 }
  0x71   :  { %v229_v61 = vadd.f32 %v228_v60, %v198_v57 }
  0x73   :  { %v230_v62 = vadd.f32 %v229_v61, %v199_v59 }
  0x75   :  { %231 = vst [vmem:[#allocation7] sm:$0xff] %v230_v62 }
  0x76   :  { %372 = shalt.err (!%p369_p6)
}
  0x77   :  { %s373_s10 = scalar_lea.hbm %s447_s2, 128 }
  0x78   :  { %p374_p7 = scmp.ne.s32.totalorder %s447_s2, %s373_s10  ;;  %p377_p8 = scmp.lt.u32.totalorder %s373_s10, %s447_s2 }
  0x7a   :  { %p379_p9 = pnand %p377_p8, %p374_p7 }
  0x7c   :  { %382 = shalt.err (!%p379_p9)
}
  0x7d   :  { %241 = dma.vmem_to_hbm [thread:$0]  %s239_s6, 128, %s447_s2, [#allocation4]  }
  0x7e   :  { %387 = dma.done.wait [#allocation4], 128  }
  0x7f   :  { %388 = vsyncadd [#allocation4], 4294967168 }
  0x80   :  { %245 = vsyncpa [#allocation3], 1 }
  0x81   :  { %246 = vsyncpa [#allocation6], 1 }
  0x82   :  { %247 = vsyncpa [#allocation4], 1 }

</bundles_post_ra>
